<compile_context>
chip_gen: v5e
topology: v5e:2x2
jax: 0.10.0
libtpu: 0.0.40
codegen_flags: <defaults>
</compile_context>

<pallas_src>
import functools
import math

import jax
import jax.numpy as jnp
from jax.experimental import pallas as pl
from jax.experimental.pallas import tpu as pltpu

_MiB = 1024 * 1024
# Per-step HBM byte target (input tile + output tile) to amortize the ~0.35 us
# fixed per-step overhead; 512-1024 row f32 tiles measured at 85-86% of roofline.
_TARGET_STEP_BYTES = 6 * _MiB
# Require this many grid steps (when rows permit) so both v7x TensorCores get
# work and DMA/compute overlap is preserved.
_MIN_GRID_STEPS = 8


def _vmem_budgets():
    """Returns (buffer_budget_bytes, scoped_vmem_limit_bytes), generation-aware."""
    try:
        cap = int(pltpu.get_tpu_info().vmem_capacity_bytes)
    except Exception:  # query unavailable (e.g. interpret mode) -> conservative
        cap = None
    if cap is None:
        return 24 * _MiB, 32 * _MiB
    if cap >= 100 * _MiB:
        # v5e / v6e: 128 MiB physical VMEM per TensorCore.
        return 48 * _MiB, 64 * _MiB
    # v7x: 64 MiB physical per TensorCore — leave headroom for compiler scratch.
    limit = min(48 * _MiB, (cap * 3) // 4)
    budget = max(16 * _MiB, limit - 12 * _MiB)
    return budget, limit


def _sublane(dtype) -> int:
    # Rows per packed vreg sublane group: 8 for 4-byte, 16 for 2-byte, 32 for 1-byte.
    return max(8, 32 // jnp.dtype(dtype).itemsize)


def _choose_block_rows(rows, dim_padded, x_dtype, out_dtype, buffer_budget,
                       override_rows=None):
    x_bytes = jnp.dtype(x_dtype).itemsize
    o_bytes = jnp.dtype(out_dtype).itemsize

    # VMEM bookkeeping: double-buffered input + output tiles, plus the f32
    # working tile that must stay live across the mean reduction when x/out
    # are low precision.
    per_row_vmem = 2 * dim_padded * (x_bytes + o_bytes)
    if x_bytes != 4 or o_bytes != 4:
        per_row_vmem += dim_padded * 4
    max_rows_budget = max(8, buffer_budget // per_row_vmem)

    # HBM bytes moved per row per step (one input read + one output write).
    per_row_step = dim_padded * (x_bytes + o_bytes)
    target_rows = max(8, _TARGET_STEP_BYTES // per_row_step)
    if override_rows is not None:
        target_rows = int(override_rows)

    sub = max(_sublane(x_dtype), _sublane(out_dtype))
    br = min(int(target_rows), int(max_rows_budget))

    # Guarantee >= _MIN_GRID_STEPS grid steps for large inputs (pipelining +
    # megacore sharding of the "parallel" row axis).
    if rows >= _MIN_GRID_STEPS * sub:
        br = min(br, rows // _MIN_GRID_STEPS)

    br = max(sub, (br // sub) * sub)  # sublane-aligned
    if rows <= br:
        # Tiny inputs only (the cap above prevents this for large rows):
        # a single block equal to the full array extent is always legal.
        return rows
    return br


def _rmsnorm_kernel(x_ref, w_ref, o_ref, *, eps, inv_dim):
    # x_ref: (block_rows, dim_padded) tile; w_ref: (1, dim_padded) resident tile.
    x = x_ref[...].astype(jnp.float32)                       # x.float()
    # mean over the *real* dim (padded lanes are zero, so the sum is exact).
    ms = jnp.sum(x * x, axis=-1, keepdims=True) * inv_dim
    normed = (x * jax.lax.rsqrt(ms + eps)).astype(x_ref.dtype)  # .type_as(x)
    # output * weight in the PyTorch-promoted dtype (== o_ref.dtype); for
    # bf16 x / bf16 weight this stays in bf16 and skips the f32 round trip.
    o_ref[...] = normed.astype(o_ref.dtype) * w_ref[...].astype(o_ref.dtype)


def rms_norm(x, weight, eps: float, *, block_rows=None, keep_input_dtype=False):
    """RMSNorm over the last axis of `x` using a Pallas TPU kernel.

    keep_input_dtype=True (opt-in) casts a higher-precision weight down to
    x.dtype so the output stays in x.dtype (halves output HBM bytes); this
    deviates from PyTorch's promotion rules, hence off by default.
    """
    orig_shape = x.shape
    dim = orig_shape[-1]
    rows = int(math.prod(orig_shape[:-1])) if len(orig_shape) > 1 else 1

    if keep_input_dtype:
        weight = weight.astype(x.dtype)
    out_dtype = jnp.promote_types(x.dtype, weight.dtype)

    # Lane padding so output stores are unmasked full-lane vst.
    dim_padded = max(128, ((dim + 127) // 128) * 128)
    x2d = x.reshape(rows, dim)
    w1d = weight.reshape(dim)
    if dim_padded != dim:
        x2d = jnp.pad(x2d, ((0, 0), (0, dim_padded - dim)))
        w1d = jnp.pad(w1d, (0, dim_padded - dim))
    w2d = w1d.reshape(1, dim_padded)

    buffer_budget, vmem_limit = _vmem_budgets()
    tm = _choose_block_rows(rows, dim_padded, x2d.dtype, out_dtype,
                            buffer_budget, override_rows=block_rows)
    grid = (pl.cdiv(rows, tm),)  # ragged tail block handled by Pallas masking

    kernel = functools.partial(_rmsnorm_kernel, eps=eps, inv_dim=1.0 / dim)
    out = pl.pallas_call(
        kernel,
        out_shape=jax.ShapeDtypeStruct((rows, dim_padded), out_dtype),
        grid_spec=pltpu.PrefetchScalarGridSpec(
            num_scalar_prefetch=0,
            grid=grid,
            in_specs=[
                pl.BlockSpec((tm, dim_padded), lambda i: (i, 0)),
                pl.BlockSpec((1, dim_padded), lambda i: (0, 0)),
            ],
            out_specs=pl.BlockSpec((tm, dim_padded), lambda i: (i, 0)),
        ),
        compiler_params=pltpu.CompilerParams(
            dimension_semantics=("parallel",),
            vmem_limit_bytes=vmem_limit,
        ),
    )(x2d, w2d)

    if dim_padded != dim:
        out = out[:, :dim]
    return out.reshape(orig_shape[:-1] + (dim,))


def rms_norm_ref(x, weight, eps: float):
    xf = x.astype(jnp.float32)
    ms = jnp.mean(xf * xf, axis=-1, keepdims=True)
    normed = (xf * jax.lax.rsqrt(ms + eps)).astype(x.dtype)
    return normed * weight


if __name__ == "__main__":
    eps = 1e-6

    # Case 1: f32, small hidden dim (32 < 128) exercises the lane-padding path.
    batch, seq, hidden = 2, 8, 32
    key = jax.random.PRNGKey(0)
    x = jax.random.normal(key, (batch, seq, hidden), dtype=jnp.float32)
    weight = jnp.ones((hidden,), dtype=jnp.float32)  # nn.Parameter(torch.ones(dim))

    out = jax.block_until_ready(rms_norm(x, weight, eps))
    ref = rms_norm_ref(x, weight, eps)
    assert out.shape == x.shape and out.dtype == ref.dtype, (out.shape, out.dtype)
    assert jnp.allclose(out, ref, atol=1e-5, rtol=1e-5), "f32 mismatch vs reference"

    # Case 2: bf16 x with bf16 weight, ragged row count (21 rows): exercises the
    # boundary-block path and the low-precision final multiply.
    hidden2 = 256
    x2 = jax.random.normal(jax.random.PRNGKey(0), (3, 7, hidden2), dtype=jnp.bfloat16)
    w2 = jnp.ones((hidden2,), dtype=jnp.bfloat16)
    out2 = jax.block_until_ready(rms_norm(x2, w2, eps))
    ref2 = rms_norm_ref(x2, w2, eps)
    assert out2.shape == x2.shape and out2.dtype == ref2.dtype
    assert jnp.allclose(
        out2.astype(jnp.float32), ref2.astype(jnp.float32), atol=2e-2, rtol=2e-2
    ), "bf16 mismatch vs reference"

    # Case 3: bf16 x with f32 weight + keep_input_dtype flag (bf16 output).
    out3 = jax.block_until_ready(
        rms_norm(x2, weight_f32 := jnp.ones((hidden2,), jnp.float32), eps,
                 keep_input_dtype=True))
    assert out3.dtype == jnp.bfloat16
    assert jnp.allclose(
        out3.astype(jnp.float32), ref2.astype(jnp.float32), atol=2e-2, rtol=2e-2
    ), "keep_input_dtype mismatch vs reference"

    print("KERNEL_OK")
</pallas_src>

<mosaic_0001>
module attributes {stable_mosaic.version = 11 : i64} {
  func.func @_rmsnorm_kernel(%arg0: i32, %arg1: memref<16x128xf32, #tpu.memory_space<vmem>>, %arg2: memref<1x128xf32, #tpu.memory_space<vmem>>, %arg3: memref<16x128xf32, #tpu.memory_space<vmem>>) attributes {dimension_semantics = [#tpu.dimension_semantics<parallel>], iteration_bounds = array<i64: 1>, scalar_prefetch = 0 : i64, scratch_operands = 0 : i64, tpu.core_type = #tpu.core_type<tc>, window_params = [{transform_indices = @transform_0, window_bounds = array<i64: 16, 128>}, {pipeline_mode = #tpu.pipeline_mode<synchronous>, transform_indices = @transform_1, window_bounds = array<i64: 1, 128>}, {transform_indices = @transform_2, window_bounds = array<i64: 16, 128>}]} {
    %c0 = arith.constant 0 : index
    %c0_0 = arith.constant 0 : index
    %0 = vector.load %arg1[%c0, %c0_0] : memref<16x128xf32, #tpu.memory_space<vmem>>, vector<16x128xf32>
    %1 = arith.mulf %0, %0 : vector<16x128xf32>
    %cst = arith.constant dense<0.000000e+00> : vector<16xf32>
    %2 = vector.multi_reduction <add>, %1, %cst [1] : vector<16x128xf32> to vector<16xf32>
    %3 = vector.shape_cast %2 : vector<16xf32> to vector<16x1xf32>
    %cst_1 = arith.constant 3.125000e-02 : f32
    %4 = vector.broadcast %cst_1 : f32 to vector<16x1xf32>
    %5 = arith.mulf %3, %4 : vector<16x1xf32>
    %cst_2 = arith.constant 9.99999997E-7 : f32
    %6 = vector.broadcast %cst_2 : f32 to vector<16x1xf32>
    %7 = arith.addf %5, %6 : vector<16x1xf32>
    %8 = math.rsqrt %7 : vector<16x1xf32>
    %9 = vector.broadcast %8 : vector<16x1xf32> to vector<16x128xf32>
    %10 = arith.mulf %0, %9 : vector<16x128xf32>
    %c0_3 = arith.constant 0 : index
    %c0_4 = arith.constant 0 : index
    %11 = vector.load %arg2[%c0_3, %c0_4] : memref<1x128xf32, #tpu.memory_space<vmem>>, vector<1x128xf32>
    %12 = vector.broadcast %11 : vector<1x128xf32> to vector<16x128xf32>
    %13 = arith.mulf %10, %12 : vector<16x128xf32>
    %c0_5 = arith.constant 0 : index
    %c0_6 = arith.constant 0 : index
    %14 = vector.load %arg3[%c0_5, %c0_6] : memref<16x128xf32, #tpu.memory_space<vmem>>, vector<16x128xf32>
    tpu.vector_store %arg3[%c0_5, %c0_6], %13 {strides = array<i32>} : memref<16x128xf32, #tpu.memory_space<vmem>>, vector<16x128xf32>,
    return
  }
  func.func @transform_0(%arg0: i32) -> (i32, i32) {
    %c0_i32 = arith.constant 0 : i32
    %c0_i32_0 = arith.constant 0 : i32
    return %arg0, %c0_i32 : i32, i32
  }
  func.func @transform_1(%arg0: i32) -> (i32, i32) {
    %c0_i32 = arith.constant 0 : i32
    %c0_i32_0 = arith.constant 0 : i32
    %c0_i32_1 = arith.constant 0 : i32
    return %c0_i32, %c0_i32_0 : i32, i32
  }
  func.func @transform_2(%arg0: i32) -> (i32, i32) {
    %c0_i32 = arith.constant 0 : i32
    %c0_i32_0 = arith.constant 0 : i32
    return %arg0, %c0_i32 : i32, i32
  }
}

</mosaic_0001>

<bundles_post_ra>
// kernel: tpu_custom_call.1
= control target key start
LH: loop header
LB: loop body
LE: loop exit
PB: predicated region body
PF: predicated region fallthrough
CT: control target
= control target key end

     0   :  { %7 = vsyncpa [#allocation3], 0  ;;  %s227_s0 = inlined_call_operand.hbm [shape: f32[16,128], index: 0, kind: input, shape index: {}]   ;;  %s228_s1 = inlined_call_operand.hbm [shape: f32[1,128], index: 1, kind: input, shape index: {}]   ;;  %s229_s2 = inlined_call_operand.hbm [shape: f32[16,128], index: 2, kind: output, shape index: {}]  }
   0x1   :  { %8 = vsyncpa [#allocation6], 0 }
   0x2   :  { %9 = vsyncpa [#allocation4], 0  ;;  %s14_s11 = sshll.u32 %s227_s0, 4  ;;  %s192_s12 = smov [#allocation2]   ;;  %s15_s11 = int_to_ptr.hbm [resolvable:$true] %s14_s11 }
   0x3   :  { %s16_s13 = sshll.u32 %s192_s12, 4  ;;  %s28_s16 = sshll.u32 %s228_s1, 4  ;;  %s17_s13 = int_to_ptr.vmem [resolvable:$true] %s16_s13  ;;  %s29_s16 = int_to_ptr.hbm [resolvable:$true] %s28_s16 }
   0x4   :  { %s193_s17 = smov 128   ;;  %s194_s18 = smov 8  }
   0x5   :  { %22 = dma.hbm_to_vmem [thread:$0]  %s15_s11, 256, %s17_s13, [#allocation3], %s193_s17, %s193_s17, %s194_s18  }
   0x6   :  { %s195_s19 = smov [#allocation5]  }
   0x7   :  { %s30_s20 = sshll.u32 %s195_s19, 4  ;;  %s31_s20 = int_to_ptr.vmem [resolvable:$true] %s30_s20 }
   0x8   :  { %33 = dma.hbm_to_vmem [thread:$0]  %s29_s16, 16, %s31_s20, [#allocation6]  }
   0x9   :  { %186 = dma.done.wait [#allocation3], 256  }
   0xa   :  { %187 = vsyncadd [#allocation3], 4294967040 }
   0xb   :  { %188 = dma.done.wait [#allocation6], 16  }
   0xc   :  { %189 = vsyncadd [#allocation6], 4294967280  ;;  %v42_v0 = vld [vmem:[#allocation2] sm:$0xff]  ;;  %v43_v2 = vld [vmem:[#allocation2 + $0x8] sm:$0xff]  ;;  %s196_s0 = smov [#allocation7]   ;;  %s90_s23 = sshll.u32 %s229_s2, 4  ;;  %s91_s23 = int_to_ptr.hbm [resolvable:$true] %s90_s23 }
   0xd   :  { %v44_v1 = vmul.f32 %v42_v0, %v42_v0  ;;  %v45_v3 = vmul.f32 %v43_v2, %v43_v2  ;;  %v109_v18 = vld [vmem:[#allocation5] ss:$0 sm:$0xff]  ;;  %s88_s1 = sshll.u32 %s196_s0, 4  ;;  %s89_s1 = int_to_ptr.vmem [resolvable:$true] %s88_s1 }
   0xf   :  { %46 = vadd.xlane.f32.xlu0 %v44_v1 }
  0x17   :  { %48 = vadd.xlane.f32.xlu0 %v45_v3 }
  0x82   :  { %v47_v4 = vpop.xlane.xlu0 %46 }
  0x83   :  { %v50_v5 = vmul.f32 0.03125, %v47_v4 }
  0x85   :  { %v52_v6 = vadd.f32 1e-06, %v50_v5 }
  0x87   :  { %110 = vrsqrt.f32 %v52_v6  ;;  %vm60_vm1 = vweird.f32 %v52_v6 }
  0x8a   :  { %v49_v7 = vpop.xlane.xlu0 %48 }
  0x8b   :  { %v51_v8 = vmul.f32 0.03125, %v49_v7 }
  0x8d   :  { %v111_v9 = vpop.eup %110  ;;  %v53_v10 = vadd.f32 1e-06, %v51_v8 }
  0x8e   :  { %v55_v11 = vmul.f32 %v111_v9, %v52_v6  ;;  %vm61_vm0 = vweird.f32 %v111_v9 }
  0x8f   :  { %112 = vrsqrt.f32 %v53_v10  ;;  %vm62_vm2 = vmor %vm60_vm1, %vm61_vm0  ;;  %vm70_vm4 = vweird.f32 %v53_v10 }
  0x90   :  { %v56_v12 = vmul.f32 %v111_v9, %v55_v11 }
  0x92   :  { %v57_v13 = vmul.f32 0.5, %v56_v12 }
  0x94   :  { %v58_v14 = vsub.f32 1.5, %v57_v13 }
  0x95   :  { %v113_v15 = vpop.eup %112 }
  0x96   :  { %v59_v16 = vmul.f32 %v111_v9, %v58_v14  ;;  %v65_v17 = vmul.f32 %v113_v15, %v53_v10  ;;  %vm71_vm3 = vweird.f32 %v113_v15 }
  0x97   :  { %vm72_vm5 = vmor %vm70_vm4, %vm71_vm3 }
  0x98   :  { %v63_v19 = vsel %vm62_vm2, %v111_v9, %v59_v16  ;;  %v66_v20 = vmul.f32 %v113_v15, %v65_v17 }
  0x99   :  { %v74_v21 = vmul.f32 %v63_v19, %v42_v0 }
  0x9a   :  { %v67_v22 = vmul.f32 0.5, %v66_v20 }
  0x9b   :  { %v80_v23 = vmul.f32 %v109_v18, %v74_v21 }
  0x9c   :  { %v68_v24 = vsub.f32 1.5, %v67_v22 }
  0x9d   :  { %82 = vst [vmem:[#allocation7] sm:$0xff] %v80_v23 }
  0x9e   :  { %v69_v25 = vmul.f32 %v113_v15, %v68_v24 }
  0xa0   :  { %v73_v26 = vsel %vm72_vm5, %v113_v15, %v69_v25 }
  0xa1   :  { %v75_v27 = vmul.f32 %v73_v26, %v43_v2 }
  0xa3   :  { %v81_v28 = vmul.f32 %v109_v18, %v75_v27 }
  0xa5   :  { %83 = vst [vmem:[#allocation7 + $0x8] sm:$0xff] %v81_v28 }
  0xa6   :  { %96 = dma.vmem_to_hbm [thread:$0]  %s89_s1, 256, %s91_s23, [#allocation4], %s193_s17, %s193_s17, %s194_s18  }
  0xa7   :  { %190 = dma.done.wait [#allocation4], 256  }
  0xa8   :  { %191 = vsyncadd [#allocation4], 4294967040 }
  0xa9   :  { %101 = vsyncpa [#allocation3], 1 }
  0xaa   :  { %102 = vsyncpa [#allocation6], 1 }
  0xab   :  { %103 = vsyncpa [#allocation4], 1 }

</bundles_post_ra>
